<compile_context>
chip_gen: v6e
topology: v6e:2x2x1
jax: 0.10.0
libtpu: 0.0.40
codegen_flags: <defaults>
</compile_context>

<pallas_src>
import functools
import math

import jax
import jax.numpy as jnp
from jax.experimental import pallas as pl
from jax.experimental.pallas import tpu as pltpu


# -----------------------------------------------------------------------------
# helpers / per-generation budgets
# -----------------------------------------------------------------------------
def _round_up(x, m):
    return (x + m - 1) // m * m


_HW = None


def _hw_config():
    """Budgets derived from the chip's physical VMEM capacity."""
    global _HW
    if _HW is None:
        cap = 64 * 1024 * 1024
        try:
            cap = int(getattr(pltpu.get_tpu_info(), "vmem_capacity_bytes", cap))
        except Exception:
            pass
        big = cap >= 100 * 1024 * 1024          # v5e / v6e: 128 MiB VMEM
        _HW = dict(
            vmem_limit=int(min(0.7 * cap, 96 * 1024 * 1024)),
            a_budget=(8 if big else 4) * 1024 * 1024,    # full-K bf16 A tile
            b_budget=(24 if big else 14) * 1024 * 1024,  # resident B (x2 buf)
            tm_target=512 if big else 256,
        )
    return _HW


def _cparams(dims):
    return pltpu.CompilerParams(dimension_semantics=dims,
                                vmem_limit_bytes=_hw_config()["vmem_limit"])


def _choose_tm(M, K):
    """Row tile: keep the full-K bf16 A tile within budget and prefer a tile
    that divides round_up(M, 16) (avoids jnp.pad-copying the patch matrix)."""
    hw = _hw_config()
    tm_cap = max(16, min(hw["tm_target"],
                         (hw["a_budget"] // (2 * max(K, 1))) // 16 * 16))
    Mp16 = _round_up(M, 16)
    if Mp16 <= tm_cap:
        return Mp16, Mp16
    t = tm_cap
    lo = max(16, tm_cap // 2)
    while t >= lo:
        if Mp16 % t == 0:
            return t, Mp16
        t -= 16
    return tm_cap, _round_up(M, tm_cap)


def _pad2d(x, rows, cols):
    r, c = x.shape
    if r == rows and c == cols:
        return x
    return jnp.pad(x, ((0, rows - r), (0, cols - c)))


def _row_tile(rows, target, align):
    tr = min(target, _round_up(rows, align))
    return tr, _round_up(rows, tr)


# -----------------------------------------------------------------------------
# Pallas kernels
# -----------------------------------------------------------------------------
def _mm_epilogue_kernel(a_ref, b_ref, scale_ref, shift_ref, o_ref, *,
                        slope, has_scale):
    # full-K matmul (f32 accumulation) + fused per-channel affine + LeakyReLU,
    # bf16 store.
    y = jnp.dot(a_ref[...], b_ref[...], preferred_element_type=jnp.float32)
    if has_scale:
        y = y * scale_ref[...]
    y = y + shift_ref[...]
    if slope != 1.0:
        y = jnp.where(y > 0, y, slope * y)
    o_ref[...] = y.astype(o_ref.dtype)


def _mm_stats_kernel(a_ref, b_ref, o_ref, sum_ref, sq_ref):
    # full-K matmul, bf16 store; per-row-tile partial channel sum / sum-of-sq.
    y = jnp.dot(a_ref[...], b_ref[...], preferred_element_type=jnp.float32)
    o_ref[...] = y.astype(o_ref.dtype)
    sum_ref[...] = jnp.sum(y, axis=0, keepdims=True).reshape(sum_ref.shape)
    sq_ref[...] = jnp.sum(y * y, axis=0, keepdims=True).reshape(sq_ref.shape)


def _affine_act_kernel(x_ref, scale_ref, shift_ref, o_ref, *, slope):
    y = x_ref[...].astype(jnp.float32) * scale_ref[...] + shift_ref[...]
    o_ref[...] = jnp.where(y > 0, y, slope * y).astype(o_ref.dtype)


def _lpips_score_kernel(f0_ref, f1_ref, w_ref, o_ref, acc_ref, *, inv_hw):
    # channel-normalize (rsqrt), squared diff, lin-weighted channel reduce and
    # spatial-mean accumulation for one sample / row tile.
    t = pl.program_id(1)

    @pl.when(t == 0)
    def _():
        acc_ref[...] = jnp.zeros_like(acc_ref)

    f0 = f0_ref[0].astype(jnp.float32)
    f1 = f1_ref[0].astype(jnp.float32)
    n0 = f0 * jax.lax.rsqrt(jnp.sum(f0 * f0, axis=-1, keepdims=True) + 1e-10)
    n1 = f1 * jax.lax.rsqrt(jnp.sum(f1 * f1, axis=-1, keepdims=True) + 1e-10)
    d = n0 - n1
    s = jnp.sum((d * d) * w_ref[...])
    acc_ref[...] += jnp.broadcast_to(s, acc_ref.shape)

    @pl.when(t == pl.num_programs(1) - 1)
    def _():
        o_ref[...] = (acc_ref[...] * inv_hw).reshape(o_ref.shape)


def _absdiff_partial_kernel(x_ref, y_ref, o_ref):
    s = jnp.sum(jnp.abs(x_ref[...] - y_ref[...]), axis=0, keepdims=True)
    o_ref[...] = s.reshape(o_ref.shape)


def _masked_partial_kernel(x_ref, o_ref, *, elem, n_real, tr, ncols):
    t = pl.program_id(0)
    x = x_ref[...]
    rows = jax.lax.broadcasted_iota(jnp.int32, x.shape, 0)
    cols = jax.lax.broadcasted_iota(jnp.int32, x.shape, 1)
    idx = (t * tr + rows) * ncols + cols
    v = jnp.where(idx < n_real, elem(x), 0.0)
    o_ref[...] = jnp.sum(v, axis=0, keepdims=True).reshape(o_ref.shape)


# -----------------------------------------------------------------------------
# Pallas wrappers
# -----------------------------------------------------------------------------
def _prep_nc(wmat, scale, shift):
    """Only pad the channel axis when OC < 64 (tiny final disc conv)."""
    K, N = wmat.shape
    Np = N if N >= 64 else 128
    if Np != N:
        wmat = _pad2d(wmat, K, Np)
    sc = (jnp.zeros((1, Np), jnp.float32) if scale is None else
          _pad2d(scale.reshape(1, N).astype(jnp.float32), 1, Np))
    sh = _pad2d(shift.reshape(1, N).astype(jnp.float32), 1, Np)
    return wmat, sc, sh, Np


def pallas_conv_matmul(patches, wmat, shift, scale=None, slope=0.0):
    """(M,K)bf16 @ (K,N)bf16 -> bf16 with fused (scale*)x+shift + LeakyReLU.
    B stays resident in VMEM (full N, constant index_map) whenever it fits."""
    M, K = patches.shape
    N = wmat.shape[1]
    wmat, sc, sh, Np = _prep_nc(wmat, scale, shift)
    has_scale = scale is not None
    tm, Mp = _choose_tm(M, K)
    a = _pad2d(patches, Mp, K)
    kern = functools.partial(_mm_epilogue_kernel, slope=float(slope),
                             has_scale=has_scale)
    hw = _hw_config()
    if 2 * K * Np * 2 <= hw["b_budget"]:                 # resident-B path
        out = pl.pallas_call(
            kern,
            out_shape=jax.ShapeDtypeStruct((Mp, Np), jnp.bfloat16),
            grid_spec=pltpu.PrefetchScalarGridSpec(
                num_scalar_prefetch=0,
                grid=(Mp // tm,),
                in_specs=[pl.BlockSpec((tm, K), lambda i: (i, 0)),
                          pl.BlockSpec((K, Np), lambda i: (0, 0)),
                          pl.BlockSpec((1, Np), lambda i: (0, 0)),
                          pl.BlockSpec((1, Np), lambda i: (0, 0))],
                out_specs=pl.BlockSpec((tm, Np), lambda i: (i, 0))),
            compiler_params=_cparams(("parallel",)),
        )(a, wmat, sc, sh)
    else:                                                # cold fallback
        tn = 256 if Np % 256 == 0 else 128
        Np2 = _round_up(Np, tn)
        wmat = _pad2d(wmat, K, Np2)
        sc = _pad2d(sc, 1, Np2)
        sh = _pad2d(sh, 1, Np2)
        out = pl.pallas_call(
            kern,
            out_shape=jax.ShapeDtypeStruct((Mp, Np2), jnp.bfloat16),
            grid_spec=pltpu.PrefetchScalarGridSpec(
                num_scalar_prefetch=0,
                grid=(Mp // tm, Np2 // tn),
                in_specs=[pl.BlockSpec((tm, K), lambda i, j: (i, 0)),
                          pl.BlockSpec((K, tn), lambda i, j: (0, j)),
                          pl.BlockSpec((1, tn), lambda i, j: (0, j)),
                          pl.BlockSpec((1, tn), lambda i, j: (0, j))],
                out_specs=pl.BlockSpec((tm, tn), lambda i, j: (i, j))),
            compiler_params=_cparams(("parallel", "parallel")),
        )(a, wmat, sc, sh)
    if out.shape != (M, N):
        out = out[:M, :N]
    return out


def pallas_conv_matmul_stats(patches, wmat):
    """Conv matmul (raw bf16 output, rows possibly padded) + per-channel
    sum / sum-of-squares assembled from per-row-tile partials (parallel grid,
    patch matrix streamed exactly once, weights resident)."""
    M, K = patches.shape
    N = wmat.shape[1]
    hw = _hw_config()
    if 2 * K * N * 2 > hw["b_budget"]:        # cold fallback (never hit here)
        raw = pallas_conv_matmul(patches, wmat,
                                 shift=jnp.zeros((N,), jnp.float32),
                                 scale=None, slope=1.0)
        r32 = raw.astype(jnp.float32)
        return raw, jnp.sum(r32, axis=0), jnp.sum(r32 * r32, axis=0)
    tm, Mp = _choose_tm(M, K)
    a = _pad2d(patches, Mp, K)
    G = Mp // tm
    out, ps, pq = pl.pallas_call(
        _mm_stats_kernel,
        out_shape=(jax.ShapeDtypeStruct((Mp, N), jnp.bfloat16),
                   jax.ShapeDtypeStruct((G, 1, N), jnp.float32),
                   jax.ShapeDtypeStruct((G, 1, N), jnp.float32)),
        grid_spec=pltpu.PrefetchScalarGridSpec(
            num_scalar_prefetch=0,
            grid=(G,),
            in_specs=[pl.BlockSpec((tm, K), lambda i: (i, 0)),
                      pl.BlockSpec((K, N), lambda i: (0, 0))],
            out_specs=[pl.BlockSpec((tm, N), lambda i: (i, 0)),
                       pl.BlockSpec((1, 1, N), lambda i: (i, 0, 0)),
                       pl.BlockSpec((1, 1, N), lambda i: (i, 0, 0))]),
        compiler_params=_cparams(("parallel",)),
    )(a, wmat)
    return out, jnp.sum(ps[:, 0, :], axis=0), jnp.sum(pq[:, 0, :], axis=0)


def affine_act(x2d, scale, shift, slope, row_tile=1024):
    """Row-tiled per-channel affine + LeakyReLU on a bf16 (P, OC) slab."""
    P, OC = x2d.shape
    tr, Pp = _row_tile(P, row_tile, 16)
    xp = _pad2d(x2d, Pp, OC)
    sc = scale.reshape(1, OC).astype(jnp.float32)
    sh = shift.reshape(1, OC).astype(jnp.float32)
    out = pl.pallas_call(
        functools.partial(_affine_act_kernel, slope=float(slope)),
        out_shape=jax.ShapeDtypeStruct((Pp, OC), jnp.bfloat16),
        grid_spec=pltpu.PrefetchScalarGridSpec(
            num_scalar_prefetch=0,
            grid=(Pp // tr,),
            in_specs=[pl.BlockSpec((tr, OC), lambda t: (t, 0)),
                      pl.BlockSpec((1, OC), lambda t: (0, 0)),
                      pl.BlockSpec((1, OC), lambda t: (0, 0))],
            out_specs=pl.BlockSpec((tr, OC), lambda t: (t, 0))),
        compiler_params=_cparams(("parallel",)),
    )(xp, sc, sh)
    return out


def lpips_scale_score(f_both, lin_w, n):
    """f_both: (2n, hw, c) bf16 features (inputs then reconstructions).
    Returns per-sample spatial mean of the channel-normalized squared diff
    weighted by lin_w -> (n,).  Sample i and i+n are indexed by two BlockSpecs
    on the SAME array (no slicing copies)."""
    _, hw, c = f_both.shape
    tr, hwp = _row_tile(hw, 512, 16)
    if hwp != hw:
        f_both = jnp.pad(f_both, ((0, 0), (0, hwp - hw), (0, 0)))
    out = pl.pallas_call(
        functools.partial(_lpips_score_kernel, inv_hw=1.0 / hw),
        out_shape=jax.ShapeDtypeStruct((n, 1, 128), jnp.float32),
        grid_spec=pltpu.PrefetchScalarGridSpec(
            num_scalar_prefetch=0,
            grid=(n, hwp // tr),
            in_specs=[pl.BlockSpec((1, tr, c), lambda i, t: (i, t, 0)),
                      pl.BlockSpec((1, tr, c), lambda i, t: (i + n, t, 0)),
                      pl.BlockSpec((1, c), lambda i, t: (0, 0))],
            out_specs=pl.BlockSpec((1, 1, 128), lambda i, t: (i, 0, 0)),
            scratch_shapes=[pltpu.VMEM((1, 128), jnp.float32)]),
        compiler_params=_cparams(("parallel", "arbitrary")),
    )(f_both, f_both, lin_w.reshape(1, c).astype(jnp.float32))
    return out[:, 0, 0]


def pallas_sum(x, elem=None, row_tile=2048):
    """sum(elem(x)) over all elements via per-tile partials on a 'parallel'
    grid axis + tiny XLA final sum."""
    flat = jnp.ravel(x).astype(jnp.float32)
    n = int(flat.shape[0])
    ncols = 128
    rows = -(-n // ncols)
    tr, rows_p = _row_tile(rows, row_tile, 8)
    total = rows_p * ncols
    if total != n:
        flat = jnp.pad(flat, (0, total - n))
    x2 = flat.reshape(rows_p, ncols)
    fn = (lambda v: v) if elem is None else elem
    G = rows_p // tr
    out = pl.pallas_call(
        functools.partial(_masked_partial_kernel, elem=fn, n_real=n,
                          tr=tr, ncols=ncols),
        out_shape=jax.ShapeDtypeStruct((G, 1, ncols), jnp.float32),
        grid_spec=pltpu.PrefetchScalarGridSpec(
            num_scalar_prefetch=0,
            grid=(G,),
            in_specs=[pl.BlockSpec((tr, ncols), lambda t: (t, 0))],
            out_specs=pl.BlockSpec((1, 1, ncols), lambda t: (t, 0, 0))),
        compiler_params=_cparams(("parallel",)),
    )(x2)
    return jnp.sum(out)


def pallas_mean(x):
    return pallas_sum(x) / x.size


def pallas_absdiff_sum(x, y, row_tile=2048):
    """sum(|x - y|) over all elements (per-tile partials, parallel grid)."""
    fx = jnp.ravel(x).astype(jnp.float32)
    fy = jnp.ravel(y).astype(jnp.float32)
    n = int(fx.shape[0])
    ncols = 128
    rows = -(-n // ncols)
    tr, rows_p = _row_tile(rows, row_tile, 8)
    total = rows_p * ncols
    if total != n:
        fx = jnp.pad(fx, (0, total - n))
        fy = jnp.pad(fy, (0, total - n))
    G = rows_p // tr
    out = pl.pallas_call(
        _absdiff_partial_kernel,
        out_shape=jax.ShapeDtypeStruct((G, 1, ncols), jnp.float32),
        grid_spec=pltpu.PrefetchScalarGridSpec(
            num_scalar_prefetch=0,
            grid=(G,),
            in_specs=[pl.BlockSpec((tr, ncols), lambda t: (t, 0)),
                      pl.BlockSpec((tr, ncols), lambda t: (t, 0))],
            out_specs=pl.BlockSpec((1, 1, ncols), lambda t: (t, 0, 0))),
        compiler_params=_cparams(("parallel",)),
    )(fx.reshape(rows_p, ncols), fy.reshape(rows_p, ncols))
    return jnp.sum(out)


# -----------------------------------------------------------------------------
# Conv via im2col (NHWC) + fused Pallas matmul
# -----------------------------------------------------------------------------
def _im2col(x_nhwc, kh, kw, stride, padding):
    """NHWC -> (N*OH*OW, KH*KW*C) bf16 patch matrix + output spatial dims.
    TODO(synk): still materialized in HBM; in-kernel halo-DMA patch build
    would remove this 9-16x activation expansion."""
    N, H, W, C = x_nhwc.shape
    xp = jnp.pad(x_nhwc.astype(jnp.bfloat16),
                 ((0, 0), (padding, padding), (padding, padding), (0, 0)))
    OH = (H + 2 * padding - kh) // stride + 1
    OW = (W + 2 * padding - kw) // stride + 1
    taps = []
    for i in range(kh):
        for j in range(kw):
            taps.append(xp[:, i:i + stride * OH:stride,
                           j:j + stride * OW:stride, :])
    patches = jnp.stack(taps, axis=3)                   # (N, OH, OW, KH*KW, C)
    return patches.reshape(N * OH * OW, kh * kw * C), (N, OH, OW)


def _weight_matrix(w):
    """PyTorch (OC, C, KH, KW) -> (KH*KW*C, OC) bf16, matching _im2col order."""
    OC, C, KH, KW = w.shape
    return jnp.transpose(w, (2, 3, 1, 0)).reshape(KH * KW * C, OC).astype(
        jnp.bfloat16)


def conv2d_bias_act(x, w, bias, stride, padding, slope):
    """NHWC conv + bias + LeakyReLU(slope) (0 -> ReLU, 1 -> identity);
    bias/activation fused into the matmul store, bf16 output."""
    OC = w.shape[0]
    patches, (N, OH, OW) = _im2col(x, w.shape[2], w.shape[3], stride, padding)
    flat = pallas_conv_matmul(patches, _weight_matrix(w),
                              shift=bias.astype(jnp.float32),
                              scale=None, slope=slope)
    return flat.reshape(N, OH, OW, OC)


def conv2d_bn_leaky(x, w, gamma, beta, stride, padding, slope=0.2, eps=1e-5):
    """NHWC conv (no bias) + training-mode BatchNorm2d + LeakyReLU.
    BN statistics come out of the conv matmul as per-row-tile partials.
    TODO(synk): the affine+LeakyReLU could be folded into the NEXT conv's
    A-tile prologue (needs per-channel pad values) to save one slab pass.
    TODO(synk): var = E[x^2]-E[x]^2 in f32 can cancel for large-mean
    activations; a centered two-pass accumulation would be safer."""
    OC = w.shape[0]
    patches, (N, OH, OW) = _im2col(x, w.shape[2], w.shape[3], stride, padding)
    flat, ch_sum, ch_sq = pallas_conv_matmul_stats(patches, _weight_matrix(w))
    P = N * OH * OW
    mean = ch_sum / P
    var = ch_sq / P - mean * mean             # biased variance (PyTorch BN)
    scale = gamma / jnp.sqrt(var + eps)
    shift = beta - mean * scale
    flat = affine_act(flat, scale, shift, slope)
    return flat[:P].reshape(N, OH, OW, OC)


def _maxpool2x2(x):
    # TODO(synk): 2x2 max-pool stays as XLA reshape/max glue (cheap vs convs).
    n, h, w, c = x.shape
    return x.reshape(n, h // 2, 2, w // 2, 2, c).max(axis=(2, 4))


# -----------------------------------------------------------------------------
# Parameter initialization (deterministic, synthetic — no checkpoint loading)
# -----------------------------------------------------------------------------
_VGG_CFG = (64, 64, 'M', 128, 128, 'M', 256, 256, 256, 'M',
            512, 512, 512, 'M', 512, 512, 512)
_LPIPS_CHNS = (64, 128, 256, 512, 512)
_LPIPS_SLICE_AT = (2, 4, 7, 10, 13)   # after relu1_2/2_2/3_3/4_3/5_3
_LOGP_EPS = math.exp(-5.0)            # clamp used before log (see forward)


def _init_vgg_params(key):
    params = []
    cin = 3
    for c in _VGG_CFG:
        if c == 'M':
            params.append('M')
            continue
        key, kw_, kb_ = jax.random.split(key, 3)
        std = (2.0 / (cin * 9)) ** 0.5
        w = std * jax.random.normal(kw_, (c, cin, 3, 3), jnp.float32)
        b = 0.01 * jax.random.normal(kb_, (c,), jnp.float32)
        params.append((w, b))
        cin = c
    return params


def _init_lin_params(key):
    lins = []
    for c in _LPIPS_CHNS:
        key, k = jax.random.split(key)
        lins.append(jnp.abs(0.1 * jax.random.normal(k, (c, 1), jnp.float32)))
    return lins


def _init_disc_params(key, input_nc, ndf, n_layers):
    kw = 4
    keys = list(jax.random.split(key, 2 * (n_layers + 2)))
    ki = iter(keys)
    params = {
        'w0': 0.02 * jax.random.normal(next(ki), (ndf, input_nc, kw, kw),
                                       jnp.float32),
        'b0': jnp.zeros((ndf,), jnp.float32),
        'mid': [],
    }
    nf_mult = 1
    for n in range(1, n_layers + 1):
        nf_prev, nf_mult = nf_mult, min(2 ** n, 8)
        w = 0.02 * jax.random.normal(
            next(ki), (ndf * nf_mult, ndf * nf_prev, kw, kw), jnp.float32)
        gamma = 1.0 + 0.02 * jax.random.normal(next(ki), (ndf * nf_mult,),
                                               jnp.float32)
        beta = jnp.zeros((ndf * nf_mult,), jnp.float32)
        stride = 2 if n < n_layers else 1
        params['mid'].append(dict(w=w, gamma=gamma, beta=beta, stride=stride))
    params['wf'] = 0.02 * jax.random.normal(next(ki), (1, ndf * nf_mult, kw, kw),
                                            jnp.float32)
    params['bf'] = jnp.zeros((1,), jnp.float32)
    return params


# -----------------------------------------------------------------------------
# The module
# -----------------------------------------------------------------------------
class VQLPIPSWithDiscriminatorPallas:
    def __init__(self, disc_start, codebook_weight=1.0, pixelloss_weight=1.0,
                 disc_num_layers=3, disc_in_channels=3, disc_factor=1.0,
                 disc_weight=1.0, perceptual_weight=1.0, use_actnorm=False,
                 disc_conditional=False, disc_ndf=64, disc_loss='hinge',
                 key=None):
        assert disc_loss in ('hinge', 'vanilla')
        # TODO(synk): use_actnorm=True (ActNorm discriminator) not implemented;
        # the default (BatchNorm2d) path is implemented.
        assert not use_actnorm
        if key is None:
            key = jax.random.PRNGKey(0)
        k_vgg, k_lin, k_disc = jax.random.split(key, 3)

        self.codebook_weight = codebook_weight
        self.pixel_weight = pixelloss_weight
        self.perceptual_weight = perceptual_weight
        self.discriminator_iter_start = disc_start
        self.disc_factor = disc_factor
        self.discriminator_weight = disc_weight
        self.disc_conditional = disc_conditional
        self.disc_loss_name = disc_loss
        # mirrors self.start(): eps = exp(-5)
        self.eps = jnp.exp(jnp.float32(-5.0))

        # LPIPS (synthetic VGG16 backbone + 1x1 lin heads, eval mode), NHWC.
        self._lp_shift = jnp.array([-.030, -.088, -.188],
                                   jnp.float32).reshape(1, 1, 1, 3)
        self._lp_scale = jnp.array([.458, .448, .450],
                                   jnp.float32).reshape(1, 1, 1, 3)
        self.vgg_params = _init_vgg_params(k_vgg)
        self.lin_ws = _init_lin_params(k_lin)

        # NLayerDiscriminator (PatchGAN)
        self.disc_params = _init_disc_params(k_disc, disc_in_channels,
                                             disc_ndf, disc_num_layers)

    # ---------------- LPIPS perceptual loss ----------------
    def _vgg_features(self, x_nhwc):
        x = (x_nhwc - self._lp_shift) / self._lp_scale
        feats = []
        conv_count = 0
        for item in self.vgg_params:
            if item == 'M':
                x = _maxpool2x2(x)
                continue
            w, b = item
            x = conv2d_bias_act(x, w, b, stride=1, padding=1, slope=0.0)  # ReLU
            conv_count += 1
            if conv_count in _LPIPS_SLICE_AT:
                feats.append(x)
        return feats

    def perceptual_loss(self, x0_nchw, x1_nchw):
        """Per-sample LPIPS distance (N,); both images go through the VGG
        backbone in ONE batched pass, features consumed in place."""
        N = x0_nchw.shape[0]
        both = jnp.concatenate([x0_nchw, x1_nchw], axis=0)
        both = jnp.transpose(both, (0, 2, 3, 1)).astype(jnp.float32)   # NHWC
        feats = self._vgg_features(both)
        total = jnp.zeros((N,), jnp.float32)
        for f, lin_w in zip(feats, self.lin_ws):
            b2, h, w, c = f.shape
            total = total + lpips_scale_score(f.reshape(b2, h * w, c),
                                              lin_w.reshape(-1), N)
        return total

    # ---------------- NLayerDiscriminator ----------------
    def discriminator(self, x_nchw):
        p = self.disc_params
        x = jnp.transpose(x_nchw, (0, 2, 3, 1)).astype(jnp.float32)    # NHWC
        x = conv2d_bias_act(x, p['w0'], p['b0'], stride=2, padding=1,
                            slope=0.2)
        for layer in p['mid']:
            x = conv2d_bn_leaky(x, layer['w'], layer['gamma'], layer['beta'],
                                stride=layer['stride'], padding=1, slope=0.2)
        x = conv2d_bias_act(x, p['wf'], p['bf'], stride=1, padding=1,
                            slope=1.0)                 # bias only, no act
        return x                                       # (N, oh, ow, 1) NHWC

    # ---------------- forward ----------------
    def forward(self, codebook_loss, inputs, reconstructions, optimizer_idx,
                global_step, last_layer=None, cond=None, dw=0.1, split='train'):
        # TODO(synk): the reference forward starts with `assert False` and
        # references an undefined `self.discriminator_large`; the loss math
        # after the guard is implemented, reusing self.discriminator for the
        # "_large" term.
        N, C, H, W = inputs.shape
        chw = C * H * W
        x = inputs.astype(jnp.float32)
        r = reconstructions.astype(jnp.float32)

        # mean(|x - r| + pw * p_loss) without materializing the rec_loss slab
        abs_sum = pallas_absdiff_sum(x, r)
        if self.perceptual_weight > 0:
            p_per_sample = self.perceptual_loss(x, r)                 # (N,)
            p_sum = jnp.sum(p_per_sample)
        else:
            p_sum = jnp.float32(0.0)
        nll_loss = (abs_sum + self.perceptual_weight * chw * p_sum) / (N * chw)

        if optimizer_idx == 0:
            if dw > 0:
                assert cond is None or self.disc_conditional
                d_out = self.discriminator(reconstructions)
                # TODO(synk): the reference applies torch.log to raw
                # (unbounded) discriminator output which NaNs for logits <= 0;
                # we clamp at eps = exp(-5) (mirroring self.logp's clamp).
                g_loss = -pallas_sum(
                    d_out,
                    lambda v: jnp.log(jnp.maximum(v, _LOGP_EPS))) / d_out.size
                g_loss_large = g_loss                 # discriminator_large stub
                gloss_total = dw * (g_loss + g_loss_large)
            else:
                gloss_total = jnp.float32(0.0)
            loss = nll_loss + gloss_total
            log = {f'{split}/total_loss': loss,
                   f'{split}/nll_loss': nll_loss,
                   f'{split}/gloss_total': gloss_total}
            return loss, log

        if optimizer_idx == 1:
            both = jnp.concatenate([inputs, reconstructions], axis=0)
            logits = self.discriminator(both)        # one batched disc pass
            logits_real, logits_fake = logits[:N], logits[N:]
            n_el = logits_real.size
            if self.disc_loss_name == 'hinge':
                lr = pallas_sum(logits_real,
                                lambda v: jnp.maximum(1.0 - v, 0.0)) / n_el
                lf = pallas_sum(logits_fake,
                                lambda v: jnp.maximum(1.0 + v, 0.0)) / n_el
            else:
                lr = pallas_sum(logits_real,
                                lambda v: jax.nn.softplus(-v)) / n_el
                lf = pallas_sum(logits_fake, jax.nn.softplus) / n_el
            d_loss = 0.5 * (lr + lf)
            log = {f'{split}/disc_loss': d_loss,
                   f'{split}/logits_real': pallas_mean(logits_real),
                   f'{split}/logits_fake': pallas_mean(logits_fake)}
            return d_loss, log

        raise ValueError(f'unknown optimizer_idx {optimizer_idx}')

    __call__ = forward


# -----------------------------------------------------------------------------
if __name__ == "__main__":
    key = jax.random.PRNGKey(0)
    k_in, k_rec, k_params = jax.random.split(key, 3)

    # Small shapes consistent with the module: batch=2, 3 channels, 32x32
    # spatial (>= 32 needed for the default 3-layer PatchGAN discriminator).
    N, C, H, W = 2, 3, 32, 32
    inputs = jax.random.normal(k_in, (N, C, H, W), jnp.float32)
    reconstructions = inputs + 0.1 * jax.random.normal(k_rec, (N, C, H, W),
                                                       jnp.float32)
    codebook_loss = jnp.float32(0.0)

    model = VQLPIPSWithDiscriminatorPallas(disc_start=0, key=k_params)

    loss_g, log_g = model(codebook_loss, inputs, reconstructions,
                          optimizer_idx=0, global_step=1)
    loss_d, log_d = model(codebook_loss, inputs, reconstructions,
                          optimizer_idx=1, global_step=1)

    jax.block_until_ready((loss_g, loss_d))
    print("KERNEL_OK")
</pallas_src>

<mosaic_0001>
module attributes {stable_mosaic.version = 11 : i64} {
  func.func @_absdiff_partial_kernel(%arg0: i32, %arg1: memref<48x128xf32, #tpu.memory_space<vmem>>, %arg2: memref<48x128xf32, #tpu.memory_space<vmem>>, %arg3: memref<1x1x128xf32, #tpu.memory_space<vmem>>) attributes {dimension_semantics = [#tpu.dimension_semantics<parallel>], iteration_bounds = array<i64: 1>, scalar_prefetch = 0 : i64, scratch_operands = 0 : i64, tpu.core_type = #tpu.core_type<tc>, window_params = [{transform_indices = @transform_0, window_bounds = array<i64: 48, 128>}, {transform_indices = @transform_1, window_bounds = array<i64: 48, 128>}, {transform_indices = @transform_2, window_bounds = array<i64: 1, 1, 128>}]} {
    %c0 = arith.constant 0 : index
    %c0_0 = arith.constant 0 : index
    %0 = vector.load %arg1[%c0, %c0_0] : memref<48x128xf32, #tpu.memory_space<vmem>>, vector<48x128xf32>
    %c0_1 = arith.constant 0 : index
    %c0_2 = arith.constant 0 : index
    %1 = vector.load %arg2[%c0_1, %c0_2] : memref<48x128xf32, #tpu.memory_space<vmem>>, vector<48x128xf32>
    %2 = arith.subf %0, %1 : vector<48x128xf32>
    %3 = math.absf %2 : vector<48x128xf32>
    %cst = arith.constant dense<0.000000e+00> : vector<128xf32>
    %4 = vector.multi_reduction <add>, %3, %cst [0] : vector<48x128xf32> to vector<128xf32>
    %5 = vector.shape_cast %4 : vector<128xf32> to vector<1x128xf32>
    %6 = vector.shape_cast %5 : vector<1x128xf32> to vector<1x1x128xf32>
    %c0_3 = arith.constant 0 : index
    %c0_4 = arith.constant 0 : index
    %c0_5 = arith.constant 0 : index
    %7 = vector.load %arg3[%c0_3, %c0_4, %c0_5] : memref<1x1x128xf32, #tpu.memory_space<vmem>>, vector<1x1x128xf32>
    tpu.vector_store %arg3[%c0_3, %c0_4, %c0_5], %6 {strides = array<i32>} : memref<1x1x128xf32, #tpu.memory_space<vmem>>, vector<1x1x128xf32>,
    return
  }
  func.func @transform_0(%arg0: i32) -> (i32, i32) {
    %c0_i32 = arith.constant 0 : i32
    %c0_i32_0 = arith.constant 0 : i32
    return %arg0, %c0_i32 : i32, i32
  }
  func.func @transform_1(%arg0: i32) -> (i32, i32) {
    %c0_i32 = arith.constant 0 : i32
    %c0_i32_0 = arith.constant 0 : i32
    return %arg0, %c0_i32 : i32, i32
  }
  func.func @transform_2(%arg0: i32) -> (i32, i32, i32) {
    %c0_i32 = arith.constant 0 : i32
    %c0_i32_0 = arith.constant 0 : i32
    %c0_i32_1 = arith.constant 0 : i32
    return %arg0, %c0_i32, %c0_i32_0 : i32, i32, i32
  }
}

</mosaic_0001>

<bundles_post_ra>
// kernel: tpu_custom_call.1
= control target key start
LH: loop header
LB: loop body
LE: loop exit
PB: predicated region body
PF: predicated region fallthrough
CT: control target
= control target key end

     0   :  { %7 = vsyncpa [#allocation3], 0  ;;  %s192_s0 = inlined_call_operand.hbm [shape: f32[48,128], index: 0, kind: input, shape index: {}]   ;;  %s193_s1 = inlined_call_operand.hbm [shape: f32[48,128], index: 1, kind: input, shape index: {}]   ;;  %s194_s2 = inlined_call_operand.hbm [shape: f32[1,1,128], index: 2, kind: output, shape index: {}]  }
   0x1   :  { %8 = vsyncpa [#allocation6], 0 }
   0x2   :  { %9 = vsyncpa [#allocation4], 0  ;;  %s163_s9 = smov [#allocation2]  }
   0x3   :  { %s15_s10 = sshll.u32 %s163_s9, 4  ;;  %s16_s10 = int_to_ptr.vmem [resolvable:$true] %s15_s10 }
   0x4   :  { %s105_s11 = scalar_lea.vmem %s16_s10, 768  ;;  %p110_p1 = scmp.lt.s32.totalorder %s16_s10, %s16_s10 }
   0x5   :  { %p106_p0 = scmp.ne.s32.totalorder %s16_s10, %s105_s11  ;;  %p111_p2 = scmp.lt.s32.totalorder %s105_s11, %s105_s11 }
   0x7   :  { %p112_p3 = por %p111_p2, %p110_p1 }
   0x9   :  { %p113_p4 = pnand %p112_p3, %p106_p0 }
   0xb   :  { %116 = shalt.err (!%p113_p4)
}
   0xc   :  { %s164_s12 = smov 128   ;;  %s165_s13 = smov 8  }
   0xd   :  { %21 = dma.hbm_to_vmem [thread:$0]  %s192_s0, 768, %s16_s10, [#allocation3], %s164_s12, %s164_s12, %s165_s13  }
   0xe   :  { %s166_s16 = smov [#allocation5]  }
   0xf   :  { %s27_s17 = sshll.u32 %s166_s16, 4  ;;  %s28_s17 = int_to_ptr.vmem [resolvable:$true] %s27_s17 }
  0x10   :  { %s125_s18 = scalar_lea.vmem %s28_s17, 768  ;;  %p130_p6 = scmp.lt.s32.totalorder %s28_s17, %s28_s17 }
  0x11   :  { %p126_p5 = scmp.ne.s32.totalorder %s28_s17, %s125_s18  ;;  %p131_p7 = scmp.lt.s32.totalorder %s125_s18, %s125_s18 }
  0x13   :  { %p132_p8 = por %p131_p7, %p130_p6 }
  0x15   :  { %p133_p9 = pnand %p132_p8, %p126_p5 }
  0x17   :  { %136 = shalt.err (!%p133_p9)
}
  0x18   :  { %33 = dma.hbm_to_vmem [thread:$0]  %s193_s1, 768, %s28_s17, [#allocation6], %s164_s12, %s164_s12, %s165_s13  }
  0x19   :  { %157 = dma.done.wait [#allocation3], 768  }
  0x1a   :  { %158 = vsyncadd [#allocation3], 4294966528 }
  0x1b   :  { %159 = dma.done.wait [#allocation6], 768  }
  0x1c   :  { %160 = vsyncadd [#allocation6], 4294966528  ;;  %v40_v0 = vld [vmem:[#allocation2] sm:$0xff]  ;;  %v41_v1 = vld [vmem:[#allocation2 + $0x8] sm:$0xff]  ;;  %s167_s0 = smov [#allocation7]  }
  0x1d   :  { %v42_v2 = vld [vmem:[#allocation2 + $0x10] sm:$0xff]  ;;  %v43_v3 = vld [vmem:[#allocation2 + $0x18] sm:$0xff]  ;;  %v44_v4 = vld [vmem:[#allocation2 + $0x20] sm:$0xff]  ;;  %s82_s1 = sshll.u32 %s167_s0, 4  ;;  %s83_s1 = int_to_ptr.vmem [resolvable:$true] %s82_s1 }
  0x1e   :  { %v46_v5 = vld [vmem:[#allocation5] sm:$0xff]  ;;  %v47_v6 = vld [vmem:[#allocation5 + $0x8] sm:$0xff]  ;;  %v48_v7 = vld [vmem:[#allocation5 + $0x10] sm:$0xff]  ;;  %s137_s21 = scalar_lea.vmem %s83_s1, 16  ;;  %s141_s22 = scalar_lea.vmem %s83_s1, 32 }
  0x1f   :  { %v49_v8 = vld [vmem:[#allocation5 + $0x18] sm:$0xff]  ;;  %v50_v9 = vld [vmem:[#allocation5 + $0x20] sm:$0xff]  ;;  %v52_v10 = vsub.f32 %v40_v0, %v46_v5  ;;  %v53_v11 = vsub.f32 %v41_v1, %v47_v6  ;;  %v54_v12 = vsub.f32 %v42_v2, %v48_v7  ;;  %v51_v14 = vld [vmem:[#allocation5 + $0x28] sm:$0xff]  ;;  %p138_p10 = scmp.ne.s32.totalorder %s83_s1, %s137_s21  ;;  %p142_p11 = scmp.lt.s32.totalorder %s83_s1, %s83_s1 }
  0x20   :  { %v45_v13 = vld [vmem:[#allocation2 + $0x28] sm:$0xff]  ;;  %v55_v15 = vsub.f32 %v43_v3, %v49_v8  ;;  %v56_v16 = vsub.f32 %v44_v4, %v50_v9  ;;  %p143_p12 = scmp.lt.s32.totalorder %s141_s22, %s137_s21 }
  0x21   :  { %v58_v17 = vand.u32 2147483647, %v52_v10  ;;  %v59_v18 = vand.u32 2147483647, %v53_v11  ;;  %v60_v19 = vand.u32 2147483647, %v54_v12  ;;  %v57_v20 = vsub.f32 %v45_v13, %v51_v14 }
  0x22   :  { %v61_v21 = vand.u32 2147483647, %v55_v15  ;;  %v62_v23 = vand.u32 2147483647, %v56_v16  ;;  %p144_p13 = por %p143_p12, %p142_p11 }
  0x23   :  { %v64_v22 = vadd.f32 %v59_v18, %v58_v17  ;;  %v63_v25 = vand.u32 2147483647, %v57_v20 }
  0x24   :  { %p145_p0 = pnand %p144_p13, %p138_p10 }
  0x25   :  { %v65_v24 = vadd.f32 %v64_v22, %v60_v19 }
  0x27   :  { %v66_v26 = vadd.f32 %v65_v24, %v61_v21 }
  0x29   :  { %v67_v27 = vadd.f32 %v66_v26, %v62_v23 }
  0x2b   :  { %v68_v28 = vadd.f32 %v67_v27, %v63_v25 }
  0x2d   :  { %v69_v29 = vrot.slane %v68_v28, 4 }
  0x2f   :  { %v70_v30 = vadd.f32 %v69_v29, %v68_v28 }
  0x31   :  { %v71_v31 = vrot.slane %v70_v30, 2 }
  0x33   :  { %v72_v32 = vadd.f32 %v71_v31, %v70_v30 }
  0x35   :  { %v73_v33 = vrot.slane %v72_v32, 1 }
  0x37   :  { %v74_v34 = vadd.f32 %v73_v33, %v72_v32 }
  0x39   :  { %75 = vst [vmem:[#allocation7] sm:$0x1] %v74_v34 }
  0x3a   :  { %148 = shalt.err (!%p145_p0)
}
  0x3b   :  { %85 = dma.vmem_to_hbm [thread:$0]  %s83_s1, 16, %s194_s2, [#allocation4]  }
  0x3c   :  { %161 = dma.done.wait [#allocation4], 16  }
  0x3d   :  { %162 = vsyncadd [#allocation4], 4294967280 }
  0x3e   :  { %89 = vsyncpa [#allocation3], 1 }
  0x3f   :  { %90 = vsyncpa [#allocation6], 1 }
  0x40   :  { %91 = vsyncpa [#allocation4], 1 }

</bundles_post_ra>
